<compile_context>
chip_gen: v7x
topology: tpu7x:2x2x1
jax: 0.10.0
libtpu: 0.0.40
codegen_flags: <defaults>
</compile_context>

<pallas_src>
import jax
import jax.numpy as jnp
from jax.experimental import pallas as pl
from jax.experimental.pallas import tpu as pltpu


def _round_up(a, m):
    return ((a + m - 1) // m) * m


def mlp_kernel(x_ref, p_ref, o_ref):
    # x_ref: (8, TB) f32 -- features on sublanes, batch on lanes.
    # p_ref: (8, 128) f32 -- all weights/biases packed, resident across grid steps.
    p = p_ref[...]

    def sigmoid(z):
        # Single EUP transcendental; numerically equal to 1/(1+exp(-z)).
        return 0.5 * jnp.tanh(0.5 * z) + 0.5

    def layer(w, b, h):
        # w: (out, in), b: (out, 1), h: (in, TB) array or ref.
        # VPU broadcast-multiply-accumulate (no MXU): acc[j,:] = sum_k w[j,k]*h[k,:]
        acc = w[:, 0:1] * h[0:1, :]
        for k in range(1, w.shape[1]):
            acc = acc + w[:, k : k + 1] * h[k : k + 1, :]
        return sigmoid(acc + b)

    # Layer 1 reads feature rows directly from the input window (no (8,TB) temp).
    h1 = layer(p[0:6, 0:8], p[0:6, 8:9], x_ref)       # (6, TB)
    h2 = layer(p[0:4, 16:22], p[0:4, 24:25], h1)      # (4, TB)
    h3 = layer(p[0:1, 32:36], p[0:1, 40:41], h2)      # (1, TB)
    o_ref[...] = h3.astype(o_ref.dtype)


def pack_params(params):
    """Pack all weights/biases (87 floats) into one (8,128) f32 constant."""
    P = jnp.zeros((8, 128), jnp.float32)
    P = P.at[0:6, 0:8].set(params["w1"].astype(jnp.float32))
    P = P.at[0:6, 8:9].set(params["b1"].astype(jnp.float32)[:, None])
    P = P.at[0:4, 16:22].set(params["w2"].astype(jnp.float32))
    P = P.at[0:4, 24:25].set(params["b2"].astype(jnp.float32)[:, None])
    P = P.at[0:1, 32:36].set(params["w3"].astype(jnp.float32))
    P = P.at[0:1, 40:41].set(params["b3"].astype(jnp.float32)[:, None])
    return P


def mlp_forward(x, params, block_rows=65536):
    """x: (N, 8) float32. params: PyTorch-shaped weights (out,in), biases (out,).

    Returns (N, 1) float32, identical semantics to the torch Model.forward.
    """
    n = x.shape[0]
    assert x.shape[1] == 8

    # Lane tile: multiple of 512 rows (>=2 KiB per DMA row), large enough to
    # amortize per-step overhead, but small enough to give >=2 grid steps when
    # the batch allows (v7x has 2 TensorCores).
    block_rows = max(512, _round_up(block_rows, 512))
    tb = max(512, min(block_rows, _round_up(pl.cdiv(n, 2), 512)))

    # One XLA copy: (N, 8) -> (8, N).  No full-array pad: the cdiv grid lets
    # Pallas mask the partial last block.  Only when the whole batch is smaller
    # than a single tile do we pad (trivially cheap there).
    x_t = x.astype(jnp.float32).T
    if n < tb:
        n_eff = tb
        x_t = jnp.pad(x_t, ((0, 0), (0, n_eff - n)))
    else:
        n_eff = n
    grid = pl.cdiv(n_eff, tb)

    packed = pack_params(params)

    out_t = pl.pallas_call(
        mlp_kernel,
        out_shape=jax.ShapeDtypeStruct((1, n_eff), jnp.float32),
        grid=(grid,),
        in_specs=[
            pl.BlockSpec((8, tb), lambda i: (0, i)),    # x^T, tiled over batch lanes
            pl.BlockSpec((8, 128), lambda i: (0, 0)),   # packed params, resident
        ],
        out_specs=pl.BlockSpec((1, tb), lambda i: (0, i)),  # lane-dense output
        compiler_params=pltpu.CompilerParams(
            dimension_semantics=("parallel",),
            vmem_limit_bytes=48 * 1024 * 1024,
        ),
    )(x_t, packed)

    # Back to the PyTorch layout (N, 1); padded / masked lanes (which carry
    # sigmoid(bias) garbage) are never part of the returned slice.
    return out_t[:, :n].T


def init_params(key):
    """Deterministic init mirroring torch.nn.Linear: W (out,in), b (out,)."""
    k1, k2, k3, k4, k5, k6 = jax.random.split(key, 6)

    def lin(kw, kb, fan_in, fan_out):
        bound = 1.0 / jnp.sqrt(fan_in)
        w = jax.random.uniform(kw, (fan_out, fan_in), jnp.float32, -bound, bound)
        b = jax.random.uniform(kb, (fan_out,), jnp.float32, -bound, bound)
        return w, b

    w1, b1 = lin(k1, k2, 8, 6)
    w2, b2 = lin(k3, k4, 6, 4)
    w3, b3 = lin(k5, k6, 4, 1)
    return {"w1": w1, "b1": b1, "w2": w2, "b2": b2, "w3": w3, "b3": b3}


def reference_forward(x, p):
    h = jax.nn.sigmoid(x @ p["w1"].T + p["b1"])
    h = jax.nn.sigmoid(h @ p["w2"].T + p["b2"])
    return jax.nn.sigmoid(h @ p["w3"].T + p["b3"])


if __name__ == "__main__":
    key = jax.random.PRNGKey(0)
    kx, kp, kx2 = jax.random.split(key, 3)
    params = init_params(kp)

    # Small case (matches the PyTorch module's expected input shape).
    batch = 8
    x = jax.random.normal(kx, (batch, 8), dtype=jnp.float32)
    out = mlp_forward(x, params)
    jax.block_until_ready(out)
    ref = reference_forward(x, params)
    assert out.shape == (batch, 1)
    assert jnp.allclose(out, ref, atol=1e-5, rtol=1e-5)

    # Exercise the multi-step grid + masked partial last block (1000 = 512 + 488).
    batch2 = 1000
    x2 = jax.random.normal(kx2, (batch2, 8), dtype=jnp.float32)
    out2 = mlp_forward(x2, params, block_rows=512)
    jax.block_until_ready(out2)
    ref2 = reference_forward(x2, params)
    assert out2.shape == (batch2, 1)
    assert jnp.allclose(out2, ref2, atol=1e-5, rtol=1e-5)

    print("KERNEL_OK")
</pallas_src>

<mosaic_0001>
module attributes {stable_mosaic.version = 11 : i64} {
  func.func @mlp_kernel(%arg0: i32, %arg1: memref<8x512xf32, #tpu.memory_space<vmem>>, %arg2: memref<8x128xf32, #tpu.memory_space<vmem>>, %arg3: memref<1x512xf32, #tpu.memory_space<vmem>>) attributes {dimension_semantics = [#tpu.dimension_semantics<parallel>], iteration_bounds = array<i64: 1>, scalar_prefetch = 0 : i64, scratch_operands = 0 : i64, tpu.core_type = #tpu.core_type<tc>, window_params = [{transform_indices = @transform_0, window_bounds = array<i64: 8, 512>}, {pipeline_mode = #tpu.pipeline_mode<synchronous>, transform_indices = @transform_1, window_bounds = array<i64: 8, 128>}, {transform_indices = @transform_2, window_bounds = array<i64: 1, 512>}]} {
    %c0 = arith.constant 0 : index
    %c0_0 = arith.constant 0 : index
    %0 = vector.load %arg2[%c0, %c0_0] : memref<8x128xf32, #tpu.memory_space<vmem>>, vector<8x128xf32>
    %1 = vector.extract_strided_slice %0 {offsets = [0, 0], sizes = [6, 8], strides = [1, 1]} : vector<8x128xf32> to vector<6x8xf32>
    %2 = vector.extract_strided_slice %0 {offsets = [0, 8], sizes = [6, 1], strides = [1, 1]} : vector<8x128xf32> to vector<6x1xf32>
    %3 = vector.extract_strided_slice %1 {offsets = [0, 0], sizes = [6, 1], strides = [1, 1]} : vector<6x8xf32> to vector<6x1xf32>
    %c0_1 = arith.constant 0 : index
    %c0_2 = arith.constant 0 : index
    %4 = vector.load %arg1[%c0_1, %c0_2] : memref<8x512xf32, #tpu.memory_space<vmem>>, vector<1x512xf32>
    %5 = vector.broadcast %3 : vector<6x1xf32> to vector<6x512xf32>
    %6 = vector.broadcast %4 : vector<1x512xf32> to vector<6x512xf32>
    %7 = arith.mulf %5, %6 : vector<6x512xf32>
    %8 = vector.extract_strided_slice %1 {offsets = [0, 1], sizes = [6, 1], strides = [1, 1]} : vector<6x8xf32> to vector<6x1xf32>
    %c1 = arith.constant 1 : index
    %c0_3 = arith.constant 0 : index
    %9 = vector.load %arg1[%c1, %c0_3] : memref<8x512xf32, #tpu.memory_space<vmem>>, vector<1x512xf32>
    %10 = vector.broadcast %8 : vector<6x1xf32> to vector<6x512xf32>
    %11 = vector.broadcast %9 : vector<1x512xf32> to vector<6x512xf32>
    %12 = arith.mulf %10, %11 : vector<6x512xf32>
    %13 = arith.addf %7, %12 : vector<6x512xf32>
    %14 = vector.extract_strided_slice %1 {offsets = [0, 2], sizes = [6, 1], strides = [1, 1]} : vector<6x8xf32> to vector<6x1xf32>
    %c2 = arith.constant 2 : index
    %c0_4 = arith.constant 0 : index
    %15 = vector.load %arg1[%c2, %c0_4] : memref<8x512xf32, #tpu.memory_space<vmem>>, vector<1x512xf32>
    %16 = vector.broadcast %14 : vector<6x1xf32> to vector<6x512xf32>
    %17 = vector.broadcast %15 : vector<1x512xf32> to vector<6x512xf32>
    %18 = arith.mulf %16, %17 : vector<6x512xf32>
    %19 = arith.addf %13, %18 : vector<6x512xf32>
    %20 = vector.extract_strided_slice %1 {offsets = [0, 3], sizes = [6, 1], strides = [1, 1]} : vector<6x8xf32> to vector<6x1xf32>
    %c3 = arith.constant 3 : index
    %c0_5 = arith.constant 0 : index
    %21 = vector.load %arg1[%c3, %c0_5] : memref<8x512xf32, #tpu.memory_space<vmem>>, vector<1x512xf32>
    %22 = vector.broadcast %20 : vector<6x1xf32> to vector<6x512xf32>
    %23 = vector.broadcast %21 : vector<1x512xf32> to vector<6x512xf32>
    %24 = arith.mulf %22, %23 : vector<6x512xf32>
    %25 = arith.addf %19, %24 : vector<6x512xf32>
    %26 = vector.extract_strided_slice %1 {offsets = [0, 4], sizes = [6, 1], strides = [1, 1]} : vector<6x8xf32> to vector<6x1xf32>
    %c4 = arith.constant 4 : index
    %c0_6 = arith.constant 0 : index
    %27 = vector.load %arg1[%c4, %c0_6] : memref<8x512xf32, #tpu.memory_space<vmem>>, vector<1x512xf32>
    %28 = vector.broadcast %26 : vector<6x1xf32> to vector<6x512xf32>
    %29 = vector.broadcast %27 : vector<1x512xf32> to vector<6x512xf32>
    %30 = arith.mulf %28, %29 : vector<6x512xf32>
    %31 = arith.addf %25, %30 : vector<6x512xf32>
    %32 = vector.extract_strided_slice %1 {offsets = [0, 5], sizes = [6, 1], strides = [1, 1]} : vector<6x8xf32> to vector<6x1xf32>
    %c5 = arith.constant 5 : index
    %c0_7 = arith.constant 0 : index
    %33 = vector.load %arg1[%c5, %c0_7] : memref<8x512xf32, #tpu.memory_space<vmem>>, vector<1x512xf32>
    %34 = vector.broadcast %32 : vector<6x1xf32> to vector<6x512xf32>
    %35 = vector.broadcast %33 : vector<1x512xf32> to vector<6x512xf32>
    %36 = arith.mulf %34, %35 : vector<6x512xf32>
    %37 = arith.addf %31, %36 : vector<6x512xf32>
    %38 = vector.extract_strided_slice %1 {offsets = [0, 6], sizes = [6, 1], strides = [1, 1]} : vector<6x8xf32> to vector<6x1xf32>
    %c6 = arith.constant 6 : index
    %c0_8 = arith.constant 0 : index
    %39 = vector.load %arg1[%c6, %c0_8] : memref<8x512xf32, #tpu.memory_space<vmem>>, vector<1x512xf32>
    %40 = vector.broadcast %38 : vector<6x1xf32> to vector<6x512xf32>
    %41 = vector.broadcast %39 : vector<1x512xf32> to vector<6x512xf32>
    %42 = arith.mulf %40, %41 : vector<6x512xf32>
    %43 = arith.addf %37, %42 : vector<6x512xf32>
    %44 = vector.extract_strided_slice %1 {offsets = [0, 7], sizes = [6, 1], strides = [1, 1]} : vector<6x8xf32> to vector<6x1xf32>
    %c7 = arith.constant 7 : index
    %c0_9 = arith.constant 0 : index
    %45 = vector.load %arg1[%c7, %c0_9] : memref<8x512xf32, #tpu.memory_space<vmem>>, vector<1x512xf32>
    %46 = vector.broadcast %44 : vector<6x1xf32> to vector<6x512xf32>
    %47 = vector.broadcast %45 : vector<1x512xf32> to vector<6x512xf32>
    %48 = arith.mulf %46, %47 : vector<6x512xf32>
    %49 = arith.addf %43, %48 : vector<6x512xf32>
    %50 = vector.broadcast %2 : vector<6x1xf32> to vector<6x512xf32>
    %51 = arith.addf %49, %50 : vector<6x512xf32>
    %cst = arith.constant 5.000000e-01 : f32
    %52 = vector.broadcast %cst : f32 to vector<6x512xf32>
    %53 = arith.mulf %52, %51 : vector<6x512xf32>
    %54 = math.tanh %53 : vector<6x512xf32>
    %cst_10 = arith.constant 5.000000e-01 : f32
    %55 = vector.broadcast %cst_10 : f32 to vector<6x512xf32>
    %56 = arith.mulf %55, %54 : vector<6x512xf32>
    %cst_11 = arith.constant 5.000000e-01 : f32
    %57 = vector.broadcast %cst_11 : f32 to vector<6x512xf32>
    %58 = arith.addf %56, %57 : vector<6x512xf32>
    %59 = vector.extract_strided_slice %0 {offsets = [0, 16], sizes = [4, 6], strides = [1, 1]} : vector<8x128xf32> to vector<4x6xf32>
    %60 = vector.extract_strided_slice %0 {offsets = [0, 24], sizes = [4, 1], strides = [1, 1]} : vector<8x128xf32> to vector<4x1xf32>
    %61 = vector.extract_strided_slice %59 {offsets = [0, 0], sizes = [4, 1], strides = [1, 1]} : vector<4x6xf32> to vector<4x1xf32>
    %62 = vector.extract_strided_slice %58 {offsets = [0, 0], sizes = [1, 512], strides = [1, 1]} : vector<6x512xf32> to vector<1x512xf32>
    %63 = vector.broadcast %61 : vector<4x1xf32> to vector<4x512xf32>
    %64 = vector.broadcast %62 : vector<1x512xf32> to vector<4x512xf32>
    %65 = arith.mulf %63, %64 : vector<4x512xf32>
    %66 = vector.extract_strided_slice %59 {offsets = [0, 1], sizes = [4, 1], strides = [1, 1]} : vector<4x6xf32> to vector<4x1xf32>
    %67 = vector.extract_strided_slice %58 {offsets = [1, 0], sizes = [1, 512], strides = [1, 1]} : vector<6x512xf32> to vector<1x512xf32>
    %68 = vector.broadcast %66 : vector<4x1xf32> to vector<4x512xf32>
    %69 = vector.broadcast %67 : vector<1x512xf32> to vector<4x512xf32>
    %70 = arith.mulf %68, %69 : vector<4x512xf32>
    %71 = arith.addf %65, %70 : vector<4x512xf32>
    %72 = vector.extract_strided_slice %59 {offsets = [0, 2], sizes = [4, 1], strides = [1, 1]} : vector<4x6xf32> to vector<4x1xf32>
    %73 = vector.extract_strided_slice %58 {offsets = [2, 0], sizes = [1, 512], strides = [1, 1]} : vector<6x512xf32> to vector<1x512xf32>
    %74 = vector.broadcast %72 : vector<4x1xf32> to vector<4x512xf32>
    %75 = vector.broadcast %73 : vector<1x512xf32> to vector<4x512xf32>
    %76 = arith.mulf %74, %75 : vector<4x512xf32>
    %77 = arith.addf %71, %76 : vector<4x512xf32>
    %78 = vector.extract_strided_slice %59 {offsets = [0, 3], sizes = [4, 1], strides = [1, 1]} : vector<4x6xf32> to vector<4x1xf32>
    %79 = vector.extract_strided_slice %58 {offsets = [3, 0], sizes = [1, 512], strides = [1, 1]} : vector<6x512xf32> to vector<1x512xf32>
    %80 = vector.broadcast %78 : vector<4x1xf32> to vector<4x512xf32>
    %81 = vector.broadcast %79 : vector<1x512xf32> to vector<4x512xf32>
    %82 = arith.mulf %80, %81 : vector<4x512xf32>
    %83 = arith.addf %77, %82 : vector<4x512xf32>
    %84 = vector.extract_strided_slice %59 {offsets = [0, 4], sizes = [4, 1], strides = [1, 1]} : vector<4x6xf32> to vector<4x1xf32>
    %85 = vector.extract_strided_slice %58 {offsets = [4, 0], sizes = [1, 512], strides = [1, 1]} : vector<6x512xf32> to vector<1x512xf32>
    %86 = vector.broadcast %84 : vector<4x1xf32> to vector<4x512xf32>
    %87 = vector.broadcast %85 : vector<1x512xf32> to vector<4x512xf32>
    %88 = arith.mulf %86, %87 : vector<4x512xf32>
    %89 = arith.addf %83, %88 : vector<4x512xf32>
    %90 = vector.extract_strided_slice %59 {offsets = [0, 5], sizes = [4, 1], strides = [1, 1]} : vector<4x6xf32> to vector<4x1xf32>
    %91 = vector.extract_strided_slice %58 {offsets = [5, 0], sizes = [1, 512], strides = [1, 1]} : vector<6x512xf32> to vector<1x512xf32>
    %92 = vector.broadcast %90 : vector<4x1xf32> to vector<4x512xf32>
    %93 = vector.broadcast %91 : vector<1x512xf32> to vector<4x512xf32>
    %94 = arith.mulf %92, %93 : vector<4x512xf32>
    %95 = arith.addf %89, %94 : vector<4x512xf32>
    %96 = vector.broadcast %60 : vector<4x1xf32> to vector<4x512xf32>
    %97 = arith.addf %95, %96 : vector<4x512xf32>
    %cst_12 = arith.constant 5.000000e-01 : f32
    %98 = vector.broadcast %cst_12 : f32 to vector<4x512xf32>
    %99 = arith.mulf %98, %97 : vector<4x512xf32>
    %100 = math.tanh %99 : vector<4x512xf32>
    %cst_13 = arith.constant 5.000000e-01 : f32
    %101 = vector.broadcast %cst_13 : f32 to vector<4x512xf32>
    %102 = arith.mulf %101, %100 : vector<4x512xf32>
    %cst_14 = arith.constant 5.000000e-01 : f32
    %103 = vector.broadcast %cst_14 : f32 to vector<4x512xf32>
    %104 = arith.addf %102, %103 : vector<4x512xf32>
    %105 = vector.extract_strided_slice %0 {offsets = [0, 32], sizes = [1, 4], strides = [1, 1]} : vector<8x128xf32> to vector<1x4xf32>
    %106 = vector.extract_strided_slice %0 {offsets = [0, 40], sizes = [1, 1], strides = [1, 1]} : vector<8x128xf32> to vector<1x1xf32>
    %107 = vector.extract_strided_slice %105 {offsets = [0, 0], sizes = [1, 1], strides = [1, 1]} : vector<1x4xf32> to vector<1x1xf32>
    %108 = vector.extract_strided_slice %104 {offsets = [0, 0], sizes = [1, 512], strides = [1, 1]} : vector<4x512xf32> to vector<1x512xf32>
    %109 = vector.broadcast %107 : vector<1x1xf32> to vector<1x512xf32>
    %110 = arith.mulf %109, %108 : vector<1x512xf32>
    %111 = vector.extract_strided_slice %105 {offsets = [0, 1], sizes = [1, 1], strides = [1, 1]} : vector<1x4xf32> to vector<1x1xf32>
    %112 = vector.extract_strided_slice %104 {offsets = [1, 0], sizes = [1, 512], strides = [1, 1]} : vector<4x512xf32> to vector<1x512xf32>
    %113 = vector.broadcast %111 : vector<1x1xf32> to vector<1x512xf32>
    %114 = arith.mulf %113, %112 : vector<1x512xf32>
    %115 = arith.addf %110, %114 : vector<1x512xf32>
    %116 = vector.extract_strided_slice %105 {offsets = [0, 2], sizes = [1, 1], strides = [1, 1]} : vector<1x4xf32> to vector<1x1xf32>
    %117 = vector.extract_strided_slice %104 {offsets = [2, 0], sizes = [1, 512], strides = [1, 1]} : vector<4x512xf32> to vector<1x512xf32>
    %118 = vector.broadcast %116 : vector<1x1xf32> to vector<1x512xf32>
    %119 = arith.mulf %118, %117 : vector<1x512xf32>
    %120 = arith.addf %115, %119 : vector<1x512xf32>
    %121 = vector.extract_strided_slice %105 {offsets = [0, 3], sizes = [1, 1], strides = [1, 1]} : vector<1x4xf32> to vector<1x1xf32>
    %122 = vector.extract_strided_slice %104 {offsets = [3, 0], sizes = [1, 512], strides = [1, 1]} : vector<4x512xf32> to vector<1x512xf32>
    %123 = vector.broadcast %121 : vector<1x1xf32> to vector<1x512xf32>
    %124 = arith.mulf %123, %122 : vector<1x512xf32>
    %125 = arith.addf %120, %124 : vector<1x512xf32>
    %126 = vector.broadcast %106 : vector<1x1xf32> to vector<1x512xf32>
    %127 = arith.addf %125, %126 : vector<1x512xf32>
    %cst_15 = arith.constant 5.000000e-01 : f32
    %128 = vector.broadcast %cst_15 : f32 to vector<1x512xf32>
    %129 = arith.mulf %128, %127 : vector<1x512xf32>
    %130 = math.tanh %129 : vector<1x512xf32>
    %cst_16 = arith.constant 5.000000e-01 : f32
    %131 = vector.broadcast %cst_16 : f32 to vector<1x512xf32>
    %132 = arith.mulf %131, %130 : vector<1x512xf32>
    %cst_17 = arith.constant 5.000000e-01 : f32
    %133 = vector.broadcast %cst_17 : f32 to vector<1x512xf32>
    %134 = arith.addf %132, %133 : vector<1x512xf32>
    %c0_18 = arith.constant 0 : index
    %c0_19 = arith.constant 0 : index
    %135 = vector.load %arg3[%c0_18, %c0_19] : memref<1x512xf32, #tpu.memory_space<vmem>>, vector<1x512xf32>
    tpu.vector_store %arg3[%c0_18, %c0_19], %134 {strides = array<i32>} : memref<1x512xf32, #tpu.memory_space<vmem>>, vector<1x512xf32>,
    return
  }
  func.func @transform_0(%arg0: i32) -> (i32, i32) {
    %c0_i32 = arith.constant 0 : i32
    %c0_i32_0 = arith.constant 0 : i32
    return %c0_i32, %arg0 : i32, i32
  }
  func.func @transform_1(%arg0: i32) -> (i32, i32) {
    %c0_i32 = arith.constant 0 : i32
    %c0_i32_0 = arith.constant 0 : i32
    %c0_i32_1 = arith.constant 0 : i32
    return %c0_i32, %c0_i32_0 : i32, i32
  }
  func.func @transform_2(%arg0: i32) -> (i32, i32) {
    %c0_i32 = arith.constant 0 : i32
    %c0_i32_0 = arith.constant 0 : i32
    return %c0_i32, %arg0 : i32, i32
  }
}

</mosaic_0001>

<bundles_post_ra>
// kernel: tpu_custom_call.1
= control target key start
LH: loop header
LB: loop body
LE: loop exit
PB: predicated region body
PF: predicated region fallthrough
CT: control target
= control target key end

     0   :  { %7 = vsyncpa [#allocation3], 0  ;;  %s1006_s0 = inlined_call_operand.hbm [shape: f32[8,512], index: 0, kind: input, shape index: {}]   ;;  %s1007_s1 = inlined_call_operand.hbm [shape: f32[8,128], index: 1, kind: input, shape index: {}]   ;;  %s1008_s2 = inlined_call_operand.hbm [shape: f32[1,512], index: 2, kind: output, shape index: {}]  }
   0x1   :  { %8 = vsyncpa [#allocation6], 0 }
   0x2   :  { %9 = vsyncpa [#allocation4], 0  ;;  %s813_s9 = smov [#allocation2]   ;;  %s814_s11 = smov [#allocation5]  }
   0x3   :  { %s16_s10 = sshll.u32 %s813_s9, 4  ;;  %s26_s12 = sshll.u32 %s814_s11, 4  ;;  %s17_s10 = int_to_ptr.vmem [resolvable:$true] %s16_s10  ;;  %s27_s12 = int_to_ptr.vmem [resolvable:$true] %s26_s12 }
   0x4   :  { %s741_s15 = scalar_lea.hbm %s1006_s0, 512 }
   0x5   :  { %p742_p0 = scmp.ne.s32.totalorder %s1006_s0, %s741_s15  ;;  %p745_p1 = scmp.lt.u32.totalorder %s741_s15, %s1006_s0 }
   0x7   :  { %p747_p2 = pnand %p745_p1, %p742_p0 }
   0x9   :  { %750 = shalt.err (!%p747_p2)
}
   0xa   :  { %s751_s20 = scalar_lea.vmem %s17_s10, 512  ;;  %p756_p4 = scmp.lt.s32.totalorder %s17_s10, %s17_s10 }
   0xb   :  { %p752_p3 = scmp.ne.s32.totalorder %s17_s10, %s751_s20  ;;  %p757_p5 = scmp.lt.s32.totalorder %s751_s20, %s751_s20 }
   0xd   :  { %p758_p6 = por %p757_p5, %p756_p4 }
   0xf   :  { %p759_p7 = pnand %p758_p6, %p752_p3 }
  0x11   :  { %762 = shalt.err (!%p759_p7)
}
  0x12   :  { %19 = dma.hbm_to_vmem [thread:$0]  %s1006_s0, 512, %s17_s10, [#allocation3]  }
  0x13   :  { %s763_s25 = scalar_lea.hbm %s1007_s1, 128 }
  0x14   :  { %p764_p8 = scmp.ne.s32.totalorder %s1007_s1, %s763_s25  ;;  %p767_p9 = scmp.lt.u32.totalorder %s763_s25, %s1007_s1 }
  0x16   :  { %p769_p10 = pnand %p767_p9, %p764_p8 }
  0x18   :  { %772 = shalt.err (!%p769_p10)
}
  0x19   :  { %s773_s30 = scalar_lea.vmem %s27_s12, 128  ;;  %p778_p12 = scmp.lt.s32.totalorder %s27_s12, %s27_s12 }
  0x1a   :  { %p774_p11 = scmp.ne.s32.totalorder %s27_s12, %s773_s30  ;;  %p779_p13 = scmp.lt.s32.totalorder %s773_s30, %s773_s30 }
  0x1c   :  { %p780_p0 = por %p779_p13, %p778_p12 }
  0x1e   :  { %p781_p1 = pnand %p780_p0, %p774_p11 }
  0x20   :  { %784 = shalt.err (!%p781_p1)
}
  0x21   :  { %29 = dma.hbm_to_vmem [thread:$0]  %s1007_s1, 128, %s27_s12, [#allocation6]  }
  0x22   :  { %807 = dma.done.wait [#allocation3], 512  }
  0x23   :  { %808 = vsyncadd [#allocation3], 4294966784 }
  0x24   :  { %809 = dma.done.wait [#allocation6], 128  }
  0x25   :  { %810 = vsyncadd [#allocation6], 4294967168  ;;  %v815_v0 = vmov 2   ;;  %v816_v1 = vmov 0   ;;  %v36_v2 = vld [vmem:[#allocation5] sm:$0xff]  ;;  %v817_v3 = vmov 3   ;;  %v44_v22 = vlaneseq }
  0x26   :  { %698 = vset.pattern.permute.xlu1 %v815_v0  ;;  %696 = vset.pattern.permute.xlu0 %v816_v1  ;;  %v818_v4 = vmov 1   ;;  %v819_v5 = vmov 4   ;;  %v820_v6 = vmov 5   ;;  %v821_v7 = vmov 6   ;;  %s837_s1 = smov [#allocation7]  }
  0x27   :  { %106 = vperm.xlu1 %698, %v36_v2   ;;  %40 = vperm.xlu0 %696, %v36_v2   ;;  %v822_v8 = vmov 8   ;;  %v823_v9 = vmov 7   ;;  %v824_v10 = vmov 18   ;;  %v825_v11 = vmov 16   ;;  %s661_s4 = sshll.u32 %s837_s1, 4  ;;  %s662_s4 = int_to_ptr.vmem [resolvable:$true] %s661_s4 }
  0x28   :  { %v826_v12 = vmov 21   ;;  %v827_v13 = vmov 17   ;;  %v828_v14 = vmov 33   ;;  %v829_v15 = vmov 19   ;;  %s785_s5 = scalar_lea.vmem %s662_s4, 64  ;;  %p790_p3 = scmp.lt.s32.totalorder %s662_s4, %s662_s4 }
  0x29   :  { %v830_v16 = vmov 40   ;;  %v831_v17 = vmov 20   ;;  %v832_v18 = vmov 24   ;;  %v833_v19 = vmov 32   ;;  %p786_p2 = scmp.ne.s32.totalorder %s662_s4, %s785_s5  ;;  %p791_p4 = scmp.lt.s32.totalorder %s785_s5, %s785_s5 }
  0x2a   :  { %v834_v20 = vmov 34   ;;  %v835_v21 = vmov 35   ;;  %v878_v23 = vshrl.u32 %v44_v22, 7  ;;  %v104_v28 = vld [vmem:[#allocation2 + $0x2] ss:$8 sm:$0xf] }
  0x2b   :  { %699 = vset.pattern.permute.xlu1 %v817_v3  ;;  %697 = vset.pattern.permute.xlu0 %v818_v4  ;;  %v37_v29 = vld [vmem:[#allocation2] ss:$8 sm:$0xf]  ;;  %v139_v30 = vld [vmem:[#allocation2 + $0x3] ss:$8 sm:$0xf]  ;;  %p792_p5 = por %p791_p4, %p790_p3 }
  0x2c   :  { %141 = vperm.xlu1 %699, %v36_v2   ;;  %71 = vperm.xlu0 %697, %v36_v2   ;;  %v881_v24 = vsub.s32 0, %v878_v23  ;;  %v884_v25 = vsub.s32 1, %v878_v23  ;;  %v887_v26 = vsub.s32 2, %v878_v23  ;;  %v890_v27 = vsub.s32 3, %v878_v23 }
  0x2d   :  { %v69_v35 = vld [vmem:[#allocation2 + $0x1] ss:$8 sm:$0xf]  ;;  %v174_v40 = vld [vmem:[#allocation2 + $0x4] ss:$8 sm:$0xf]  ;;  %p793_p6 = pnand %p792_p5, %p786_p2 }
  0x2e   :  { %v113_v31 = vrot.slane %v104_v28, %v881_v24  ;;  %v117_v32 = vrot.slane %v104_v28, %v884_v25  ;;  %v121_v33 = vrot.slane %v104_v28, %v887_v26  ;;  %v125_v34 = vrot.slane %v104_v28, %v890_v27  ;;  %v904_v47 = vld [vmem:[#allocation2 + $0x5] ss:$8 sm:$0xf]  ;;  %v910_v52 = vld [vmem:[#allocation2 + $0x6] ss:$8 sm:$0xf] }
  0x2f   :  { %v47_v36 = vrot.slane %v37_v29, %v881_v24  ;;  %v51_v37 = vrot.slane %v37_v29, %v884_v25  ;;  %v55_v38 = vrot.slane %v37_v29, %v887_v26  ;;  %v59_v39 = vrot.slane %v37_v29, %v890_v27  ;;  %v916_v57 = vld [vmem:[#allocation2 + $0x7] ss:$8 sm:$0xf] }
  0x30   :  { %700 = vset.pattern.permute.xlu1 %v819_v5  ;;  %701 = vset.pattern.permute.xlu0 %v820_v6  ;;  %v148_v43 = vrot.slane %v139_v30, %v881_v24  ;;  %v152_v44 = vrot.slane %v139_v30, %v884_v25  ;;  %v156_v45 = vrot.slane %v139_v30, %v887_v26  ;;  %vm652_vm0 = vcmp.lt.s32.totalorder %v44_v22, 512 }
  0x31   :  { %176 = vperm.xlu1 %700, %v36_v2   ;;  %211 = vperm.xlu0 %701, %v36_v2   ;;  %v160_v46 = vrot.slane %v139_v30, %v890_v27  ;;  %v78_v48 = vrot.slane %v69_v35, %v881_v24  ;;  %v82_v49 = vrot.slane %v69_v35, %v884_v25 }
  0x32   :  { %v86_v50 = vrot.slane %v69_v35, %v887_v26  ;;  %v90_v51 = vrot.slane %v69_v35, %v890_v27  ;;  %v183_v53 = vrot.slane %v174_v40, %v881_v24  ;;  %v187_v54 = vrot.slane %v174_v40, %v884_v25 }
  0x33   :  { %v191_v55 = vrot.slane %v174_v40, %v887_v26  ;;  %v195_v56 = vrot.slane %v174_v40, %v890_v27  ;;  %v218_v58 = vrot.slane %v904_v47, %v881_v24  ;;  %v222_v59 = vrot.slane %v904_v47, %v884_v25 }
  0x34   :  { %v226_v60 = vrot.slane %v904_v47, %v887_v26  ;;  %v230_v61 = vrot.slane %v904_v47, %v890_v27  ;;  %v253_v62 = vrot.slane %v910_v52, %v881_v24  ;;  %v257_v63 = vrot.slane %v910_v52, %v884_v25 }
  0x35   :  { %702 = vset.pattern.permute.xlu1 %v821_v7  ;;  %704 = vset.pattern.permute.xlu0 %v822_v8  ;;  %v261_v0 = vrot.slane %v910_v52, %v887_v26  ;;  %v265_v1 = vrot.slane %v910_v52, %v890_v27  ;;  %v288_v4 = vrot.slane %v916_v57, %v881_v24 }
  0x36   :  { %246 = vperm.xlu1 %702, %v36_v2   ;;  %314 = vperm.xlu0 %704, %v36_v2   ;;  %v292_v5 = vrot.slane %v916_v57, %v884_v25  ;;  %v296_v6 = vrot.slane %v916_v57, %v887_v26  ;;  %v300_v7 = vrot.slane %v916_v57, %v890_v27 }
  0x3a   :  { %703 = vset.pattern.permute.xlu1 %v823_v9  ;;  %707 = vset.pattern.permute.xlu0 %v824_v10 }
  0x3b   :  { %281 = vperm.xlu1 %703, %v36_v2   ;;  %390 = vperm.xlu0 %707, %v36_v2  }
  0x3f   :  { %705 = vset.pattern.permute.xlu1 %v825_v11  ;;  %710 = vset.pattern.permute.xlu0 %v826_v12 }
  0x40   :  { %338 = vperm.xlu1 %705, %v36_v2   ;;  %474 = vperm.xlu0 %710, %v36_v2  }
  0x44   :  { %706 = vset.pattern.permute.xlu1 %v827_v13  ;;  %713 = vset.pattern.permute.xlu0 %v828_v14 }
  0x45   :  { %362 = vperm.xlu1 %706, %v36_v2   ;;  %534 = vperm.xlu0 %713, %v36_v2  }
  0x49   :  { %708 = vset.pattern.permute.xlu1 %v829_v15  ;;  %716 = vset.pattern.permute.xlu0 %v830_v16 }
  0x4a   :  { %418 = vperm.xlu1 %708, %v36_v2   ;;  %598 = vperm.xlu0 %716, %v36_v2  }
  0x4e   :  { %709 = vset.pattern.permute.xlu1 %v831_v17 }
  0x4f   :  { %446 = vperm.xlu1 %709, %v36_v2  }
  0x53   :  { %711 = vset.pattern.permute.xlu1 %v832_v18 }
  0x54   :  { %502 = vperm.xlu1 %711, %v36_v2  }
  0x58   :  { %712 = vset.pattern.permute.xlu1 %v833_v19 }
  0x59   :  { %526 = vperm.xlu1 %712, %v36_v2  }
  0x5d   :  { %714 = vset.pattern.permute.xlu1 %v834_v20 }
  0x5e   :  { %558 = vperm.xlu1 %714, %v36_v2  }
  0x62   :  { %715 = vset.pattern.permute.xlu1 %v835_v21 }
  0x63   :  { %578 = vperm.xlu1 %715, %v36_v2  }
  0xa6   :  { %v107_v41 = vpop.permute.xlu1 %106  ;;  %v41_v42 = vpop.permute.xlu0 %40 }
  0xa7   :  { %v64_v8 = vmul.f32 %v47_v36, %v41_v42  ;;  %v65_v9 = vmul.f32 %v51_v37, %v41_v42  ;;  %v66_v10 = vmul.f32 %v55_v38, %v41_v42  ;;  %v67_v11 = vmul.f32 %v59_v39, %v41_v42 }
  0xa8   :  { %v130_v16 = vmul.f32 %v113_v31, %v107_v41  ;;  %v131_v17 = vmul.f32 %v117_v32, %v107_v41  ;;  %v132_v18 = vmul.f32 %v121_v33, %v107_v41  ;;  %v133_v19 = vmul.f32 %v125_v34, %v107_v41 }
  0xab   :  { %v142_v2 = vpop.permute.xlu1 %141  ;;  %v72_v3 = vpop.permute.xlu0 %71 }
  0xac   :  { %v95_v12 = vmul.f32 %v78_v48, %v72_v3  ;;  %v96_v13 = vmul.f32 %v82_v49, %v72_v3  ;;  %v97_v14 = vmul.f32 %v86_v50, %v72_v3  ;;  %v98_v15 = vmul.f32 %v90_v51, %v72_v3 }
  0xad   :  { %v165_v30 = vmul.f32 %v148_v43, %v142_v2  ;;  %v166_v35 = vmul.f32 %v152_v44, %v142_v2  ;;  %v167_v40 = vmul.f32 %v156_v45, %v142_v2  ;;  %v168_v47 = vmul.f32 %v160_v46, %v142_v2 }
  0xae   :  { %v99_v20 = vadd.f32 %v95_v12, %v64_v8  ;;  %v100_v21 = vadd.f32 %v96_v13, %v65_v9  ;;  %v101_v28 = vadd.f32 %v97_v14, %v66_v10  ;;  %v102_v29 = vadd.f32 %v98_v15, %v67_v11 }
  0xb0   :  { %v177_v36 = vpop.permute.xlu1 %176  ;;  %v134_v37 = vadd.f32 %v130_v16, %v99_v20  ;;  %v135_v38 = vadd.f32 %v131_v17, %v100_v21  ;;  %v136_v39 = vadd.f32 %v132_v18, %v101_v28  ;;  %v137_v42 = vadd.f32 %v133_v19, %v102_v29  ;;  %v212_v48 = vpop.permute.xlu0 %211 }
  0xb1   :  { %v200_v49 = vmul.f32 %v183_v53, %v177_v36  ;;  %v201_v50 = vmul.f32 %v187_v54, %v177_v36  ;;  %v202_v31 = vmul.f32 %v191_v55, %v177_v36  ;;  %v203_v32 = vmul.f32 %v195_v56, %v177_v36 }
  0xb2   :  { %v169_v33 = vadd.f32 %v165_v30, %v134_v37  ;;  %v170_v34 = vadd.f32 %v166_v35, %v135_v38  ;;  %v171_v41 = vadd.f32 %v167_v40, %v136_v39  ;;  %v172_v51 = vadd.f32 %v168_v47, %v137_v42 }
  0xb3   :  { %v235_v52 = vmul.f32 %v218_v58, %v212_v48  ;;  %v236_v57 = vmul.f32 %v222_v59, %v212_v48  ;;  %v237_v43 = vmul.f32 %v226_v60, %v212_v48  ;;  %v238_v44 = vmul.f32 %v230_v61, %v212_v48 }
  0xb4   :  { %v204_v45 = vadd.f32 %v200_v49, %v169_v33  ;;  %v205_v46 = vadd.f32 %v201_v50, %v170_v34  ;;  %v206_v2 = vadd.f32 %v202_v31, %v171_v41  ;;  %v207_v3 = vadd.f32 %v203_v32, %v172_v51 }
  0xb5   :  { %v247_v8 = vpop.permute.xlu1 %246  ;;  %v315_v18 = vpop.permute.xlu0 %314 }
  0xb6   :  { %v270_v9 = vmul.f32 %v253_v62, %v247_v8  ;;  %v271_v10 = vmul.f32 %v257_v63, %v247_v8  ;;  %v272_v11 = vmul.f32 %v261_v0, %v247_v8  ;;  %v273_v53 = vmul.f32 %v265_v1, %v247_v8 }
  0xb7   :  { %v239_v54 = vadd.f32 %v235_v52, %v204_v45  ;;  %v240_v55 = vadd.f32 %v236_v57, %v205_v46  ;;  %v241_v56 = vadd.f32 %v237_v43, %v206_v2  ;;  %v242_v12 = vadd.f32 %v238_v44, %v207_v3 }
  0xb9   :  { %v274_v13 = vadd.f32 %v270_v9, %v239_v54  ;;  %v275_v14 = vadd.f32 %v271_v10, %v240_v55  ;;  %v276_v15 = vadd.f32 %v272_v11, %v241_v56  ;;  %v277_v58 = vadd.f32 %v273_v53, %v242_v12 }
  0xba   :  { %v282_v59 = vpop.permute.xlu1 %281  ;;  %v451_v53 = vsub.s32 4, %v878_v23  ;;  %v479_v54 = vsub.s32 5, %v878_v23 }
  0xbb   :  { %v305_v60 = vmul.f32 %v288_v4, %v282_v59  ;;  %v306_v61 = vmul.f32 %v292_v5, %v282_v59  ;;  %v307_v16 = vmul.f32 %v296_v6, %v282_v59  ;;  %v308_v17 = vmul.f32 %v300_v7, %v282_v59 }
  0xbd   :  { %v309_v19 = vadd.f32 %v305_v60, %v274_v13  ;;  %v310_v20 = vadd.f32 %v306_v61, %v275_v14  ;;  %v311_v62 = vadd.f32 %v307_v16, %v276_v15  ;;  %v312_v63 = vadd.f32 %v308_v17, %v277_v58 }
  0xbf   :  { %v317_v0 = vadd.f32 %v315_v18, %v309_v19  ;;  %v318_v1 = vadd.f32 %v315_v18, %v310_v20  ;;  %v319_v21 = vadd.f32 %v315_v18, %v311_v62  ;;  %v320_v28 = vadd.f32 %v315_v18, %v312_v63  ;;  %v339_v4 = vpop.permute.xlu1 %338 }
  0xc1   :  { %v321_v29 = vmul.f32 0.5, %v317_v0  ;;  %v322_v30 = vmul.f32 0.5, %v318_v1  ;;  %v323_v35 = vmul.f32 0.5, %v319_v21  ;;  %v324_v40 = vmul.f32 0.5, %v320_v28 }
  0xc3   :  { %717 = vtanh.f32 %v321_v29 }
  0xc4   :  { %719 = vtanh.f32 %v322_v30  ;;  %v363_v47 = vpop.permute.xlu1 %362 }
  0xc5   :  { %721 = vtanh.f32 %v323_v35 }
  0xc6   :  { %723 = vtanh.f32 %v324_v40 }
  0xc9   :  { %v419_v46 = vpop.permute.xlu1 %418 }
  0xcd   :  { %v718_v5 = vpop.eup %717 }
  0xce   :  { %v720_v6 = vpop.eup %719  ;;  %v329_v7 = vmul.f32 0.5, %v718_v5 }
  0xcf   :  { %v722_v36 = vpop.eup %721  ;;  %v330_v37 = vmul.f32 0.5, %v720_v6 }
  0xd0   :  { %v724_v38 = vpop.eup %723  ;;  %v331_v39 = vmul.f32 0.5, %v722_v36  ;;  %v942_v42 = vadd.f32 0.5, %v329_v7 }
  0xd1   :  { %v332_v48 = vmul.f32 0.5, %v724_v38  ;;  %v944_v49 = vadd.f32 0.5, %v330_v37 }
  0xd2   :  { %v946_v50 = vadd.f32 0.5, %v331_v39  ;;  %v344_v31 = vrot.slane %v942_v42, %v881_v24  ;;  %v368_v32 = vrot.slane %v942_v42, %v884_v25  ;;  %v424_v33 = vrot.slane %v942_v42, %v890_v27 }
  0xd3   :  { %v954_v34 = vadd.f32 0.5, %v332_v48  ;;  %v348_v41 = vrot.slane %v944_v49, %v881_v24  ;;  %v372_v51 = vrot.slane %v944_v49, %v884_v25  ;;  %v428_v52 = vrot.slane %v944_v49, %v890_v27 }
  0xd4   :  { %v352_v57 = vrot.slane %v946_v50, %v881_v24  ;;  %v357_v43 = vmul.f32 %v344_v31, %v339_v4  ;;  %v376_v44 = vrot.slane %v946_v50, %v884_v25  ;;  %v381_v45 = vmul.f32 %v368_v32, %v363_v47 }
  0xd5   :  { %v356_v2 = vrot.slane %v954_v34, %v881_v24  ;;  %v358_v3 = vmul.f32 %v348_v41, %v339_v4  ;;  %v380_v8 = vrot.slane %v954_v34, %v884_v25  ;;  %v382_v9 = vmul.f32 %v372_v51, %v363_v47  ;;  %v391_v25 = vpop.permute.xlu0 %390 }
  0xd6   :  { %v359_v10 = vmul.f32 %v352_v57, %v339_v4  ;;  %v383_v11 = vmul.f32 %v376_v44, %v363_v47  ;;  %v432_v12 = vrot.slane %v946_v50, %v890_v27  ;;  %v436_v13 = vrot.slane %v954_v34, %v890_v27  ;;  %v447_v27 = vpop.permute.xlu1 %446 }
  0xd7   :  { %v360_v55 = vmul.f32 %v356_v2, %v339_v4  ;;  %v384_v56 = vmul.f32 %v380_v8, %v363_v47  ;;  %v385_v24 = vadd.f32 %v381_v45, %v357_v43  ;;  %v386_v14 = vadd.f32 %v382_v9, %v358_v3 }
  0xd8   :  { %v387_v15 = vadd.f32 %v383_v11, %v359_v10  ;;  %v437_v58 = vmul.f32 %v424_v33, %v419_v46  ;;  %v438_v60 = vmul.f32 %v428_v52, %v419_v46  ;;  %v396_v61 = vrot.slane %v942_v42, %v887_v26 }
  0xd9   :  { %v388_v59 = vadd.f32 %v384_v56, %v360_v55  ;;  %v400_v16 = vrot.slane %v944_v49, %v887_v26  ;;  %v404_v17 = vrot.slane %v946_v50, %v887_v26  ;;  %v408_v18 = vrot.slane %v954_v34, %v887_v26  ;;  %v475_v36 = vpop.permute.xlu0 %474 }
  0xda   :  { %v452_v19 = vrot.slane %v942_v42, %v451_v53  ;;  %v456_v20 = vrot.slane %v944_v49, %v451_v53  ;;  %v439_v62 = vmul.f32 %v432_v12, %v419_v46  ;;  %v440_v63 = vmul.f32 %v436_v13, %v419_v46 }
  0xdb   :  { %v409_v0 = vmul.f32 %v396_v61, %v391_v25  ;;  %v410_v1 = vmul.f32 %v400_v16, %v391_v25  ;;  %v411_v21 = vmul.f32 %v404_v17, %v391_v25  ;;  %v412_v28 = vmul.f32 %v408_v18, %v391_v25 }
  0xdc   :  { %v460_v29 = vrot.slane %v946_v50, %v451_v53  ;;  %v464_v30 = vrot.slane %v954_v34, %v451_v53  ;;  %v465_v4 = vmul.f32 %v452_v19, %v447_v27  ;;  %v466_v5 = vmul.f32 %v456_v20, %v447_v27 }
  0xdd   :  { %v413_v35 = vadd.f32 %v409_v0, %v385_v24  ;;  %v414_v40 = vadd.f32 %v410_v1, %v386_v14  ;;  %v415_v26 = vadd.f32 %v411_v21, %v387_v15  ;;  %v416_v6 = vadd.f32 %v412_v28, %v388_v59  ;;  %v535_v0 = vpop.permute.xlu0 %534 }
  0xde   :  { %v480_v7 = vrot.slane %v942_v42, %v479_v54  ;;  %v484_v47 = vrot.slane %v944_v49, %v479_v54  ;;  %v488_v39 = vrot.slane %v946_v50, %v479_v54  ;;  %v492_v48 = vrot.slane %v954_v34, %v479_v54  ;;  %v503_v49 = vpop.permute.xlu1 %502 }
  0xdf   :  { %v441_v37 = vadd.f32 %v437_v58, %v413_v35  ;;  %v442_v38 = vadd.f32 %v438_v60, %v414_v40  ;;  %v443_v31 = vadd.f32 %v439_v62, %v415_v26  ;;  %v444_v32 = vadd.f32 %v440_v63, %v416_v6 }
  0xe0   :  { %v467_v33 = vmul.f32 %v460_v29, %v447_v27  ;;  %v468_v41 = vmul.f32 %v464_v30, %v447_v27  ;;  %v493_v57 = vmul.f32 %v480_v7, %v475_v36  ;;  %v494_v43 = vmul.f32 %v484_v47, %v475_v36 }
  0xe1   :  { %v469_v51 = vadd.f32 %v465_v4, %v441_v37  ;;  %v470_v52 = vadd.f32 %v466_v5, %v442_v38  ;;  %v495_v42 = vmul.f32 %v488_v39, %v475_v36  ;;  %v496_v46 = vmul.f32 %v492_v48, %v475_v36 }
  0xe2   :  { %v471_v44 = vadd.f32 %v467_v33, %v443_v31  ;;  %v472_v45 = vadd.f32 %v468_v41, %v444_v32  ;;  %v527_v14 = vpop.permute.xlu1 %526 }
  0xe3   :  { %v497_v2 = vadd.f32 %v493_v57, %v469_v51  ;;  %v498_v3 = vadd.f32 %v494_v43, %v470_v52 }
  0xe4   :  { %v499_v8 = vadd.f32 %v495_v42, %v471_v44  ;;  %v500_v9 = vadd.f32 %v496_v46, %v472_v45 }
  0xe5   :  { %v505_v50 = vadd.f32 %v503_v49, %v497_v2  ;;  %v506_v10 = vadd.f32 %v503_v49, %v498_v3 }
  0xe6   :  { %v507_v34 = vadd.f32 %v503_v49, %v499_v8  ;;  %v508_v11 = vadd.f32 %v503_v49, %v500_v9  ;;  %v559_v27 = vpop.permute.xlu1 %558  ;;  %v599_v8 = vpop.permute.xlu0 %598 }
  0xe7   :  { %v509_v53 = vmul.f32 0.5, %v505_v50  ;;  %v510_v54 = vmul.f32 0.5, %v506_v10 }
  0xe8   :  { %v511_v55 = vmul.f32 0.5, %v507_v34  ;;  %v512_v56 = vmul.f32 0.5, %v508_v11 }
  0xe9   :  { %725 = vtanh.f32 %v509_v53 }
  0xea   :  { %727 = vtanh.f32 %v510_v54  ;;  %v579_v36 = vpop.permute.xlu1 %578 }
  0xeb   :  { %729 = vtanh.f32 %v511_v55 }
  0xec   :  { %731 = vtanh.f32 %v512_v56 }
  0xf3   :  { %v726_v12 = vpop.eup %725 }
  0xf4   :  { %v728_v13 = vpop.eup %727  ;;  %v517_v24 = vmul.f32 0.5, %v726_v12 }
  0xf5   :  { %v730_v15 = vpop.eup %729  ;;  %v518_v58 = vmul.f32 0.5, %v728_v13 }
  0xf6   :  { %v732_v25 = vpop.eup %731  ;;  %v519_v59 = vmul.f32 0.5, %v730_v15  ;;  %v521_v61 = vadd.f32 0.5, %v517_v24 }
  0xf7   :  { %v520_v60 = vmul.f32 0.5, %v732_v25  ;;  %v522_v16 = vadd.f32 0.5, %v518_v58 }
  0xf8   :  { %v523_v17 = vadd.f32 0.5, %v519_v59  ;;  %v529_v19 = vmul.f32 %v527_v14, %v521_v61  ;;  %v561_v62 = vrot.slane %v521_v61, 2  ;;  %v581_v63 = vrot.slane %v521_v61, 3 }
  0xf9   :  { %v524_v18 = vadd.f32 0.5, %v520_v60  ;;  %v530_v20 = vmul.f32 %v527_v14, %v522_v16  ;;  %v562_v1 = vrot.slane %v522_v16, 2  ;;  %v582_v21 = vrot.slane %v522_v16, 3 }
  0xfa   :  { %v541_v28 = vrot.slane %v521_v61, 1  ;;  %v542_v29 = vrot.slane %v522_v16, 1  ;;  %v563_v30 = vrot.slane %v523_v17, 2  ;;  %v543_v40 = vrot.slane %v523_v17, 1 }
  0xfb   :  { %v564_v35 = vrot.slane %v524_v18, 2  ;;  %v544_v4 = vrot.slane %v524_v18, 1  ;;  %v531_v5 = vmul.f32 %v527_v14, %v523_v17  ;;  %v583_v26 = vrot.slane %v523_v17, 3 }
  0xfc   :  { %v549_v6 = vmul.f32 %v541_v28, %v535_v0  ;;  %v550_v7 = vmul.f32 %v542_v29, %v535_v0  ;;  %v532_v47 = vmul.f32 %v527_v14, %v524_v18  ;;  %v584_v37 = vrot.slane %v524_v18, 3 }
  0xfd   :  { %v551_v38 = vmul.f32 %v543_v40, %v535_v0  ;;  %v552_v39 = vmul.f32 %v544_v4, %v535_v0  ;;  %v569_v48 = vmul.f32 %v561_v62, %v559_v27  ;;  %v570_v31 = vmul.f32 %v562_v1, %v559_v27 }
  0xfe   :  { %v553_v32 = vadd.f32 %v549_v6, %v529_v19  ;;  %v554_v33 = vadd.f32 %v550_v7, %v530_v20  ;;  %v571_v41 = vmul.f32 %v563_v30, %v559_v27  ;;  %v572_v51 = vmul.f32 %v564_v35, %v559_v27 }
  0xff   :  { %v555_v52 = vadd.f32 %v551_v38, %v531_v5  ;;  %v556_v57 = vadd.f32 %v552_v39, %v532_v47  ;;  %v589_v43 = vmul.f32 %v581_v63, %v579_v36  ;;  %v590_v44 = vmul.f32 %v582_v21, %v579_v36 }
 0x100   :  { %v573_v45 = vadd.f32 %v569_v48, %v553_v32  ;;  %v574_v42 = vadd.f32 %v570_v31, %v554_v33  ;;  %v591_v46 = vmul.f32 %v583_v26, %v579_v36  ;;  %v592_v49 = vmul.f32 %v584_v37, %v579_v36 }
 0x101   :  { %v575_v2 = vadd.f32 %v571_v41, %v555_v52  ;;  %v576_v3 = vadd.f32 %v572_v51, %v556_v57  ;;  %v836_v14 = vmov 1966171168  }
 0x102   :  { %v593_v9 = vadd.f32 %v589_v43, %v573_v45  ;;  %v594_v50 = vadd.f32 %v590_v44, %v574_v42  ;;  %v628_v15 = vunpack.c.l.s4 %v836_v14 }
 0x103   :  { %v595_v10 = vadd.f32 %v591_v46, %v575_v2  ;;  %v596_v34 = vadd.f32 %v592_v49, %v576_v3 }
 0x104   :  { %v601_v11 = vadd.f32 %v599_v8, %v593_v9  ;;  %v602_v53 = vadd.f32 %v599_v8, %v594_v50  ;;  %v629_v25 = vunpack.c.0.s8 %v628_v15 }
 0x105   :  { %v603_v54 = vadd.f32 %v599_v8, %v595_v10  ;;  %v604_v55 = vadd.f32 %v599_v8, %v596_v34 }
 0x106   :  { %v605_v56 = vmul.f32 0.5, %v601_v11  ;;  %v606_v12 = vmul.f32 0.5, %v602_v53  ;;  %v632_v62 = vsub.s32 %v629_v25, %v878_v23 }
 0x107   :  { %v607_v13 = vmul.f32 0.5, %v603_v54  ;;  %v608_v24 = vmul.f32 0.5, %v604_v55 }
 0x108   :  { %733 = vtanh.f32 %v605_v56 }
 0x109   :  { %735 = vtanh.f32 %v606_v12 }
 0x10a   :  { %737 = vtanh.f32 %v607_v13 }
 0x10b   :  { %739 = vtanh.f32 %v608_v24 }
 0x112   :  { %v734_v58 = vpop.eup %733 }
 0x113   :  { %v736_v59 = vpop.eup %735  ;;  %v613_v60 = vmul.f32 0.5, %v734_v58 }
 0x114   :  { %v738_v61 = vpop.eup %737  ;;  %v614_v16 = vmul.f32 0.5, %v736_v59 }
 0x115   :  { %v740_v17 = vpop.eup %739  ;;  %v615_v18 = vmul.f32 0.5, %v738_v61  ;;  %v617_v27 = vadd.f32 0.5, %v613_v60 }
 0x116   :  { %v616_v19 = vmul.f32 0.5, %v740_v17  ;;  %v618_v20 = vadd.f32 0.5, %v614_v16 }
 0x117   :  { %v619_v63 = vadd.f32 0.5, %v615_v18 }
 0x118   :  { %v620_v0 = vadd.f32 0.5, %v616_v19  ;;  %v625_v1 = vcombine.low %v617_v27, %v618_v20 }
 0x11a   :  { %v626_v21 = vcombine.low %v619_v63, %v620_v0  ;;  %v633_v28 = vrot.slane %v625_v1, %v632_v62 }
 0x11c   :  { %v640_v29 = vrot.slane %v626_v21, %v632_v62 }
 0x11e   :  { %v641_v30 = vcombine.low %v633_v28, %v640_v29 }
 0x120   :  { %v648_v35 = vrot.slane %v641_v30, %v632_v62 }
 0x122   :  { %654 = vst.msk [vmem:[#allocation7] sm:$0xf] %vm652_vm0, %v648_v35 }
 0x123   :  { %796 = shalt.err (!%p793_p6)
}
 0x124   :  { %s797_s8 = scalar_lea.hbm %s1008_s2, 64 }
 0x125   :  { %p798_p7 = scmp.ne.s32.totalorder %s1008_s2, %s797_s8  ;;  %p801_p8 = scmp.lt.u32.totalorder %s797_s8, %s1008_s2 }
 0x127   :  { %p803_p9 = pnand %p801_p8, %p798_p7 }
 0x129   :  { %806 = shalt.err (!%p803_p9)
}
 0x12a   :  { %664 = dma.vmem_to_hbm [thread:$0]  %s662_s4, 64, %s1008_s2, [#allocation4]  }
 0x12b   :  { %811 = dma.done.wait [#allocation4], 64  }
 0x12c   :  { %812 = vsyncadd [#allocation4], 4294967232 }
 0x12d   :  { %668 = vsyncpa [#allocation3], 1 }
 0x12e   :  { %669 = vsyncpa [#allocation6], 1 }
 0x12f   :  { %670 = vsyncpa [#allocation4], 1 }

</bundles_post_ra>
